<compile_context>
chip_gen: v6e
topology: v6e:2x2x1
jax: 0.10.0
libtpu: 0.0.40
codegen_flags: <defaults>
</compile_context>

<pallas_src>
import functools

import jax
import jax.numpy as jnp
from jax.experimental import pallas as pl
from jax.experimental.pallas import tpu as pltpu


def _round_up(x, m):
    return ((x + m - 1) // m) * m


def _oracle_kernel(x_ref, w1_ref, b1_ref, w2_ref, b2_ref, out_ref):
    # Hidden layer: x @ W1 on the MXU (f32 accumulation), bias + ReLU in f32.
    h = jnp.dot(x_ref[...], w1_ref[...], preferred_element_type=jnp.float32)
    h = jnp.maximum(h + b1_ref[...], 0.0)
    # Output layer: h @ W2 + b2 (h cast back to the weights' compute dtype).
    o = jnp.dot(h.astype(w2_ref.dtype), w2_ref[...],
                preferred_element_type=jnp.float32)
    out_ref[...] = (o + b2_ref[...]).astype(out_ref.dtype)


def prepare_oracle_params(w1, b1, w2, b2, *, compute_dtype=jnp.bfloat16):
    """One-time parameter prep (hoisted out of the per-call path).

    Weights are cast to `compute_dtype` for the MXU (halves their HBM read);
    biases stay f32 (bias add + ReLU run in f32) and are reshaped to (1, n)
    for in-kernel broadcast.  Use compute_dtype=jnp.float32 for exact parity
    with the f32 PyTorch module.
    """
    return dict(
        w1=jnp.asarray(w1, compute_dtype),
        b1=jnp.asarray(b1, jnp.float32).reshape(1, -1),
        w2=jnp.asarray(w2, compute_dtype),
        b2=jnp.asarray(b2, jnp.float32).reshape(1, -1),
    )


@functools.partial(jax.jit, static_argnames=("tile_m",))
def _oracle_pallas(x, w1, b1, w2, b2, *, tile_m=512):
    """Pallas forward pass: relu(x @ W1 + b1) @ W2 + b2.

    Args:
      x:  (B, n_attr)
      w1: (n_attr, n_attr)     stored as (in, out), any MXU dtype
      b1: (1, n_attr)          float32
      w2: (n_attr, n_classes)  stored as (in, out)
      b2: (1, n_classes)       float32
    Returns:
      (B, n_classes) float32 logits.
    """
    B, n_attr = x.shape
    n_classes = w2.shape[1]

    # Feed activations to the MXU in the weights' compute dtype (bf16 default).
    # Ideally the caller already holds x in that dtype so this cast fuses
    # into the producer and the kernel reads half the bytes from HBM.
    x = x.astype(w1.dtype)

    # Even batch tiling: grid_m equal tiles, tm a multiple of 8 sublanes.
    grid_m = max(1, pl.cdiv(B, tile_m))
    if B > 8:
        grid_m = max(grid_m, 2)  # v7x megacore: keep both TensorCores busy.
    if grid_m == 1:
        tm = B                   # single full-batch tile: no row pad, no slice
    else:
        tm = _round_up(pl.cdiv(B, grid_m), 8)
    b_pad = grid_m * tm
    if b_pad != B:
        x = jnp.pad(x, ((0, b_pad - B), (0, 0)))

    # Weights/biases stay VMEM-resident (constant index_map).  For much larger
    # n_attr, mark these specs pipeline_mode=pl.Buffered(1) and/or raise
    # vmem_limit_bytes; at these sizes the default buffering is negligible.
    out = pl.pallas_call(
        _oracle_kernel,
        out_shape=jax.ShapeDtypeStruct((b_pad, n_classes), jnp.float32),
        grid=(grid_m,),
        in_specs=[
            pl.BlockSpec((tm, n_attr), lambda i: (i, 0)),          # x tile
            pl.BlockSpec((n_attr, n_attr), lambda i: (0, 0)),      # W1 resident
            pl.BlockSpec((1, n_attr), lambda i: (0, 0)),           # b1 resident
            pl.BlockSpec((n_attr, n_classes), lambda i: (0, 0)),   # W2 resident
            pl.BlockSpec((1, n_classes), lambda i: (0, 0)),        # b2 resident
        ],
        out_specs=pl.BlockSpec((tm, n_classes), lambda i: (i, 0)),
        compiler_params=pltpu.CompilerParams(
            # Independent batch tiles -> shard across TCs on v7x megacore.
            dimension_semantics=("parallel",)),
    )(x, w1, b1, w2, b2)

    # Padded batch rows compute relu(b1) @ W2 + b2 (nonzero) -> must slice.
    return out[:B] if b_pad != B else out


def _oracle_ref(x, w1, b1, w2, b2):
    """Plain fused-XLA forward with the same math as the kernel."""
    h = jnp.dot(x.astype(w1.dtype), w1, preferred_element_type=jnp.float32)
    h = jnp.maximum(h + b1, 0.0)
    o = jnp.dot(h.astype(w2.dtype), w2, preferred_element_type=jnp.float32)
    return o + b2


def shapes_nn_oracle(x, params, *, tile_m=512, force_pallas=False):
    """ShapesNNOracle forward with a small-problem fast path."""
    w1, b1, w2, b2 = params["w1"], params["b1"], params["w2"], params["b2"]
    B, n_attr = x.shape
    if not force_pallas and B * n_attr <= 128 * 128:
        # Fast path: at tiny sizes the pallas_call fixed overhead dwarfs the
        # ~1e4 FLOPs; a fused XLA dot is strictly faster.
        return _oracle_ref(x, w1, b1, w2, b2)
    return _oracle_pallas(x, w1, b1, w2, b2, tile_m=tile_m)


def _init_linear(key, fan_in, fan_out):
    """PyTorch-style nn.Linear init (uniform +-1/sqrt(fan_in)).

    Weight returned as (fan_in, fan_out) -- transposed relative to PyTorch's
    (out, in) storage -- plus bias (fan_out,).
    """
    kw, kb = jax.random.split(key)
    bound = 1.0 / jnp.sqrt(jnp.float32(fan_in))
    w = jax.random.uniform(kw, (fan_in, fan_out), jnp.float32, -bound, bound)
    b = jax.random.uniform(kb, (fan_out,), jnp.float32, -bound, bound)
    return w, b


if __name__ == "__main__":
    n_attr = 8      # input concepts == hidden width
    n_classes = 5   # predicted classes

    key = jax.random.PRNGKey(0)
    k1, k2, kx = jax.random.split(key, 3)

    w1, b1 = _init_linear(k1, n_attr, n_attr)      # hidden_layer: n_attr -> n_attr
    w2, b2 = _init_linear(k2, n_attr, n_classes)   # output_layer: n_attr -> n_classes
    params = prepare_oracle_params(w1, b1, w2, b2)  # done once, not per call

    # Exercise single-tile (B<=8), padded two-tile (v7x split), and multi-tile.
    for batch, tile_m in [(2, 512), (10, 512), (48, 16)]:
        kx, sub = jax.random.split(kx)
        x = jax.random.normal(sub, (batch, n_attr), jnp.float32)

        out = shapes_nn_oracle(x, params, tile_m=tile_m, force_pallas=True)
        out = jax.block_until_ready(out)

        ref = _oracle_ref(x, params["w1"], params["b1"], params["w2"], params["b2"])
        assert out.shape == (batch, n_classes)
        assert jnp.allclose(out, ref, atol=1e-4, rtol=1e-4), (batch, tile_m)

    # Small-problem fast path (plain XLA) at the module's native tiny size.
    kx, sub = jax.random.split(kx)
    x_small = jax.random.normal(sub, (2, n_attr), jnp.float32)
    jax.block_until_ready(shapes_nn_oracle(x_small, params))

    print("KERNEL_OK")
</pallas_src>

<mosaic_0001>
module attributes {stable_mosaic.version = 11 : i64} {
  func.func @_oracle_kernel(%arg0: i32, %arg1: memref<2x8xbf16, #tpu.memory_space<vmem>>, %arg2: memref<8x8xbf16, #tpu.memory_space<vmem>>, %arg3: memref<1x8xf32, #tpu.memory_space<vmem>>, %arg4: memref<8x5xbf16, #tpu.memory_space<vmem>>, %arg5: memref<1x5xf32, #tpu.memory_space<vmem>>, %arg6: memref<2x5xf32, #tpu.memory_space<vmem>>) attributes {dimension_semantics = [#tpu.dimension_semantics<parallel>], iteration_bounds = array<i64: 1>, scalar_prefetch = 0 : i64, scratch_operands = 0 : i64, tpu.core_type = #tpu.core_type<tc>, window_params = [{transform_indices = @transform_0, window_bounds = array<i64: 2, 8>}, {pipeline_mode = #tpu.pipeline_mode<synchronous>, transform_indices = @transform_1, window_bounds = array<i64: 8, 8>}, {pipeline_mode = #tpu.pipeline_mode<synchronous>, transform_indices = @transform_2, window_bounds = array<i64: 1, 8>}, {pipeline_mode = #tpu.pipeline_mode<synchronous>, transform_indices = @transform_3, window_bounds = array<i64: 8, 5>}, {pipeline_mode = #tpu.pipeline_mode<synchronous>, transform_indices = @transform_4, window_bounds = array<i64: 1, 5>}, {transform_indices = @transform_5, window_bounds = array<i64: 2, 5>}]} {
    %c0 = arith.constant 0 : index
    %c0_0 = arith.constant 0 : index
    %0 = vector.load %arg1[%c0, %c0_0] : memref<2x8xbf16, #tpu.memory_space<vmem>>, vector<2x8xbf16>
    %c0_1 = arith.constant 0 : index
    %c0_2 = arith.constant 0 : index
    %1 = vector.load %arg2[%c0_1, %c0_2] : memref<8x8xbf16, #tpu.memory_space<vmem>>, vector<8x8xbf16>
    %cst = arith.constant dense<0.000000e+00> : vector<2x8xf32>
    %2 = tpu.matmul %0, %1, %cst {dimension_numbers = #tpu.dot_dimension_numbers<[1], [0], [0], [1], [0, 0, 1, 1], [], []>} : vector<2x8xbf16>, vector<8x8xbf16>, vector<2x8xf32> -> vector<2x8xf32>
    %c0_3 = arith.constant 0 : index
    %c0_4 = arith.constant 0 : index
    %3 = vector.load %arg3[%c0_3, %c0_4] : memref<1x8xf32, #tpu.memory_space<vmem>>, vector<1x8xf32>
    %4 = vector.broadcast %3 : vector<1x8xf32> to vector<2x8xf32>
    %5 = arith.addf %2, %4 : vector<2x8xf32>
    %cst_5 = arith.constant 0.000000e+00 : f32
    %6 = vector.broadcast %cst_5 : f32 to vector<2x8xf32>
    %7 = arith.maximumf %5, %6 : vector<2x8xf32>
    %8 = arith.truncf %7 : vector<2x8xf32> to vector<2x8xbf16>
    %c0_6 = arith.constant 0 : index
    %c0_7 = arith.constant 0 : index
    %9 = vector.load %arg4[%c0_6, %c0_7] : memref<8x5xbf16, #tpu.memory_space<vmem>>, vector<8x5xbf16>
    %cst_8 = arith.constant dense<0.000000e+00> : vector<2x5xf32>
    %10 = tpu.matmul %8, %9, %cst_8 {dimension_numbers = #tpu.dot_dimension_numbers<[1], [0], [0], [1], [0, 0, 1, 1], [], []>} : vector<2x8xbf16>, vector<8x5xbf16>, vector<2x5xf32> -> vector<2x5xf32>
    %c0_9 = arith.constant 0 : index
    %c0_10 = arith.constant 0 : index
    %11 = vector.load %arg5[%c0_9, %c0_10] : memref<1x5xf32, #tpu.memory_space<vmem>>, vector<1x5xf32>
    %12 = vector.broadcast %11 : vector<1x5xf32> to vector<2x5xf32>
    %13 = arith.addf %10, %12 : vector<2x5xf32>
    %c0_11 = arith.constant 0 : index
    %c0_12 = arith.constant 0 : index
    %14 = vector.load %arg6[%c0_11, %c0_12] : memref<2x5xf32, #tpu.memory_space<vmem>>, vector<2x5xf32>
    tpu.vector_store %arg6[%c0_11, %c0_12], %13 {strides = array<i32>} : memref<2x5xf32, #tpu.memory_space<vmem>>, vector<2x5xf32>,
    return
  }
  func.func @transform_0(%arg0: i32) -> (i32, i32) {
    %c0_i32 = arith.constant 0 : i32
    %c0_i32_0 = arith.constant 0 : i32
    return %arg0, %c0_i32 : i32, i32
  }
  func.func @transform_1(%arg0: i32) -> (i32, i32) {
    %c0_i32 = arith.constant 0 : i32
    %c0_i32_0 = arith.constant 0 : i32
    %c0_i32_1 = arith.constant 0 : i32
    return %c0_i32, %c0_i32_0 : i32, i32
  }
  func.func @transform_2(%arg0: i32) -> (i32, i32) {
    %c0_i32 = arith.constant 0 : i32
    %c0_i32_0 = arith.constant 0 : i32
    %c0_i32_1 = arith.constant 0 : i32
    return %c0_i32, %c0_i32_0 : i32, i32
  }
  func.func @transform_3(%arg0: i32) -> (i32, i32) {
    %c0_i32 = arith.constant 0 : i32
    %c0_i32_0 = arith.constant 0 : i32
    %c0_i32_1 = arith.constant 0 : i32
    return %c0_i32, %c0_i32_0 : i32, i32
  }
  func.func @transform_4(%arg0: i32) -> (i32, i32) {
    %c0_i32 = arith.constant 0 : i32
    %c0_i32_0 = arith.constant 0 : i32
    %c0_i32_1 = arith.constant 0 : i32
    return %c0_i32, %c0_i32_0 : i32, i32
  }
  func.func @transform_5(%arg0: i32) -> (i32, i32) {
    %c0_i32 = arith.constant 0 : i32
    %c0_i32_0 = arith.constant 0 : i32
    return %arg0, %c0_i32 : i32, i32
  }
}

</mosaic_0001>

<bundles_post_ra>
// kernel: _oracle_pallas.1
= control target key start
LH: loop header
LB: loop body
LE: loop exit
PB: predicated region body
PF: predicated region fallthrough
CT: control target
= control target key end

     0   :  { %10 = vsyncpa [#allocation3], 0  ;;  %s284_s0 = inlined_call_operand.vmem [shape: bf16[2,8], index: 0, kind: input, shape index: {}]   ;;  %s285_s1 = inlined_call_operand.vmem [shape: bf16[8,8], index: 1, kind: input, shape index: {}]   ;;  %s286_s2 = inlined_call_operand.hbm [shape: f32[1,8], index: 2, kind: input, shape index: {}]   ;;  %s287_s3 = inlined_call_operand.vmem [shape: bf16[8,5], index: 3, kind: input, shape index: {}]   ;;  %s288_s4 = inlined_call_operand.vmem [shape: f32[1,5], index: 4, kind: input, shape index: {}]   ;;  %s289_s5 = inlined_call_operand.hbm [shape: f32[2,5], index: 5, kind: output, shape index: {}]  }
   0x1   :  { %11 = vsyncpa [#allocation4], 0  ;;  %s232_s18 = smov [#allocation2]  }
   0x2   :  { %s22_s19 = sshll.u32 %s232_s18, 4  ;;  %s23_s19 = int_to_ptr.vmem [resolvable:$true] %s22_s19 }
   0x3   :  { %s196_s20 = scalar_lea.vmem %s23_s19, 16  ;;  %s200_s21 = scalar_lea.vmem %s23_s19, 32 }
   0x4   :  { %p197_p0 = scmp.ne.s32.totalorder %s23_s19, %s196_s20  ;;  %p201_p1 = scmp.lt.s32.totalorder %s23_s19, %s23_s19 }
   0x5   :  { %p202_p2 = scmp.lt.s32.totalorder %s200_s21, %s196_s20 }
   0x7   :  { %p203_p3 = por %p202_p2, %p201_p1 }
   0x9   :  { %p204_p4 = pnand %p203_p3, %p197_p0 }
   0xb   :  { %207 = shalt.err (!%p204_p4)
}
   0xc   :  { %25 = dma.hbm_to_vmem [thread:$0]  %s286_s2, 16, %s23_s19, [#allocation3]  }
   0xd   :  { %228 = dma.done.wait [#allocation3], 16  }
   0xe   :  { %229 = vsyncadd [#allocation3], 4294967280  ;;  %v233_v0 = vmov 0.0   ;;  %vm234_vm0 = vmmov 0   ;;  %vm47_vm1 = vcmask 1043456   ;;  %vm43_vm2 = vcmask 64512  }
   0xf   :  { %172 = vmatprep.subr.bf16.mxu0 %v233_v0  ;;  %174 = vmatprep.mubr.msk.bf16.mxu0 %vm234_vm0, %v233_v0  ;;  %v35_v1 = vld [vmem:[%s285_s1] sm:$0xf]  ;;  %vm147_vm3 = vcmask 33792  }
  0x10   :  { %178 = vmatprep.subr.bf16.mxu1 %v233_v0  ;;  %180 = vmatprep.mubr.msk.bf16.mxu1 %vm234_vm0, %v233_v0  ;;  %v49_v2 = vsel %vm47_vm1, %v35_v1, 0  ;;  %v34_v3 = vld [vmem:[%s284_s0] sm:$0x1]  ;;  %s235_s0 = smov [#allocation5]  }
  0x11   :  { %173 = vmatpush3.bf16.msra.mxu0 %v49_v2  ;;  %v93_v4 = vld [vmem:[%s287_s3] sm:$0xf]  ;;  %s155_s30 = sshll.u32 %s235_s0, 4  ;;  %s156_s30 = int_to_ptr.vmem [resolvable:$true] %s155_s30 }
  0x12   :  { %v105_v5 = vsel %vm47_vm1, %v93_v4, 0  ;;  %v164_v6 = vld [vmem:[#allocation2] ss:$0 sm:$0xff]  ;;  %s208_s3 = scalar_lea.vmem %s156_s30, 32  ;;  %p213_p6 = scmp.lt.s32.totalorder %s156_s30, %s156_s30 }
  0x13   :  { %179 = vmatpush3.bf16.msra.mxu1 %v105_v5  ;;  %v166_v14 = vld [vmem:[%s288_s4] ss:$0 sm:$0xff]  ;;  %p209_p5 = scmp.ne.s32.totalorder %s156_s30, %s208_s3  ;;  %p214_p7 = scmp.lt.s32.totalorder %s208_s3, %s208_s3 }
  0x14   :  { %175 = vmatmul.mubr.msk.bf16.vlgmr.msra.gmra.mxu0 %vm43_vm2, %v34_v3 }
  0x15   :  { %p215_p8 = por %p214_p7, %p213_p6 }
  0x17   :  { %p216_p9 = pnand %p215_p8, %p209_p5 }
  0xd4   :  { %v85_v7 = vpop.f32.mrf.mxu0 }
  0xd5   :  { %v86_v8 = vadd.f32 %v164_v6, %v85_v7 }
  0xd6   :  { %v176_v9 = vpop.f32.mrf.mxu0 }
  0xd7   :  { %v91_v10 = vmax.f32 %v86_v8, 0.0 }
  0xd8   :  { %v88_v11 = vpop.f32.mrf.mxu0 }
  0xd9   :  { %v92_v12 = vpack.c.bf16 %v91_v10, %v91_v10 }
  0xda   :  { %v177_v13 = vpop.f32.mrf.mxu0 }
  0xdb   :  { %181 = vmatmul.mubr.msk.bf16.vlgmr.msra.gmra.mxu1 %vm43_vm2, %v92_v12 }
 0x19b   :  { %v141_v15 = vpop.f32.mrf.mxu1 }
 0x19c   :  { %v142_v16 = vadd.f32 %v166_v14, %v141_v15 }
 0x19d   :  { %v182_v17 = vpop.f32.mrf.mxu1 }
 0x19e   :  { %148 = vst.msk [vmem:[#allocation5] sm:$0x3] %vm147_vm3, %v142_v16 }
 0x19f   :  { %v144_v18 = vpop.f32.mrf.mxu1 }
 0x1a0   :  { %219 = shalt.err (!%p216_p9)
}
 0x1a1   :  { %158 = dma.vmem_to_hbm [thread:$0]  %s156_s30, 32, %s289_s5, [#allocation4]   ;;  %v183_v19 = vpop.f32.mrf.mxu1 }
 0x1a2   :  { %230 = dma.done.wait [#allocation4], 32  }
 0x1a3   :  { %231 = vsyncadd [#allocation4], 4294967264 }
 0x1a4   :  { %162 = vsyncpa [#allocation3], 1 }
 0x1a5   :  { %163 = vsyncpa [#allocation4], 1 }

</bundles_post_ra>
